<compile_context>
chip_gen: v7x
topology: tpu7x:2x2x1
jax: 0.10.0
libtpu: 0.0.40
codegen_flags: <defaults>
</compile_context>

<pallas_src>
import functools
import math

import jax
import jax.numpy as jnp
from jax import lax
from jax.experimental import pallas as pl
from jax.experimental.pallas import tpu as pltpu


def _pick_tile(n, candidates, max_val=None):
    """Largest candidate tile that divides n (and is <= max_val)."""
    for c in candidates:
        if (max_val is None or c <= max_val) and n % c == 0:
            return c
    return 128


# ----------------------------------------------------------------------------
# Kernel 1: fused QKV projection  y = x @ [Wq|Wk|Wv] + [bq|bk|bv]
#   grid = (Np // block_m,)  row-tiled; bf16 outputs in (N, H*D) layout.
# ----------------------------------------------------------------------------
def _fused_qkv_kernel(x_ref, w_ref, b_ref, q_ref, k_ref, v_ref, *, hd):
    y = jnp.dot(x_ref[...], w_ref[...],
                preferred_element_type=jnp.float32) + b_ref[...]
    q_ref[...] = y[:, 0 * hd:1 * hd].astype(q_ref.dtype)
    k_ref[...] = y[:, 1 * hd:2 * hd].astype(k_ref.dtype)
    v_ref[...] = y[:, 2 * hd:3 * hd].astype(v_ref.dtype)


def fused_qkv_projection(x, w_qkv, b_qkv, hd, *, block_m,
                         out_dtype=jnp.bfloat16):
    Np, in_dim = x.shape
    assert Np % block_m == 0
    out_sds = jax.ShapeDtypeStruct((Np, hd), out_dtype)
    kernel = functools.partial(_fused_qkv_kernel, hd=hd)
    row_spec = pl.BlockSpec((block_m, hd), lambda i: (i, 0))
    return pl.pallas_call(
        kernel,
        out_shape=(out_sds, out_sds, out_sds),
        grid_spec=pltpu.PrefetchScalarGridSpec(
            num_scalar_prefetch=0,
            grid=(Np // block_m,),
            in_specs=[
                pl.BlockSpec((block_m, in_dim), lambda i: (i, 0)),
                pl.BlockSpec((in_dim, 3 * hd), lambda i: (0, 0)),
                pl.BlockSpec((1, 3 * hd), lambda i: (0, 0)),
            ],
            out_specs=(row_spec, row_spec, row_spec),
        ),
        compiler_params=pltpu.CompilerParams(
            dimension_semantics=("parallel",),
        ),
    )(x, w_qkv, b_qkv)


# ----------------------------------------------------------------------------
# Kernel 2: tiled masked graph attention (SDDMM + clamp-exp + SpMM + normalize)
#   grid = (Np // block_m, Np // block_s)   dst-row tiles x src-col tiles
#   All heads handled per tile; running sums accumulate across the src axis.
#   Empty adjacency tiles (tile_nnz == 0) skip the whole compute body.
# ----------------------------------------------------------------------------
def _graph_attn_kernel(nnz_ref, q_ref, k_ref, v_ref, adj_ref, o_ref, z_ref,
                       *, num_heads, head_dim, inv_scale):
    i_idx = pl.program_id(0)
    s_idx = pl.program_id(1)

    @pl.when(s_idx == 0)
    def _init():
        o_ref[...] = jnp.zeros_like(o_ref)
        z_ref[...] = jnp.zeros_like(z_ref)

    @pl.when(nnz_ref[i_idx, s_idx] > 0)
    def _compute():
        mask = adj_ref[...].astype(jnp.float32)      # (TM, TS) in {0, 1}
        q = q_ref[...]                               # (TM, H*D) bf16
        k = k_ref[...]                               # (TS, H*D) bf16
        v = v_ref[...]                               # (TS, H*D) bf16

        wv_parts = []
        z_parts = []
        for h in range(num_heads):                   # static, fully unrolled
            lo = h * head_dim
            hi = lo + head_dim
            qh = q[:, lo:hi]
            kh = k[:, lo:hi]
            vh = v[:, lo:hi]
            # QK^T contracting the last dims (bf16 operands, f32 accumulate).
            sc = lax.dot_general(qh, kh, (((1,), (1,)), ((), ())),
                                 preferred_element_type=jnp.float32)
            sc = sc * inv_scale
            # f32 elementwise chain (v5e-safe; bf16 possible on v6e/v7x).
            e = jnp.exp(jnp.clip(sc, -5.0, 5.0)) * mask          # (TM, TS)
            z_parts.append(jnp.sum(e, axis=-1, keepdims=True))   # (TM, 1)
            wv_parts.append(jnp.dot(e.astype(v.dtype), vh,
                                    preferred_element_type=jnp.float32))

        # Single lane-dense accumulate of the (TM, H*D) slab + compact (TM, H) z.
        o_ref[...] += jnp.concatenate(wv_parts, axis=-1)
        z_ref[...] += jnp.concatenate(z_parts, axis=-1)

    @pl.when(s_idx == pl.num_programs(1) - 1)
    def _finalize():
        # Guard isolated destination nodes (z == 0 -> output 0, not NaN).
        z = jnp.maximum(z_ref[...], 1e-9)            # (TM, H)
        r = pl.reciprocal(z, approx=True)            # (TM, H)
        o = o_ref[...]
        parts = [o[:, h * head_dim:(h + 1) * head_dim] * r[:, h:h + 1]
                 for h in range(num_heads)]
        o_ref[...] = jnp.concatenate(parts, axis=-1)


def graph_attention(q, k, v, adj, tile_nnz, num_heads, head_dim, *,
                    block_m, block_s):
    Np, HD = q.shape
    assert Np % block_m == 0 and Np % block_s == 0
    inv_scale = 1.0 / math.sqrt(head_dim)

    kernel = functools.partial(_graph_attn_kernel, num_heads=num_heads,
                               head_dim=head_dim, inv_scale=inv_scale)

    q_spec = pl.BlockSpec((block_m, HD), lambda i, s, nnz: (i, 0))
    kv_spec = pl.BlockSpec((block_s, HD), lambda i, s, nnz: (s, 0))
    adj_spec = pl.BlockSpec((block_m, block_s), lambda i, s, nnz: (i, s))
    o_spec = pl.BlockSpec((block_m, HD), lambda i, s, nnz: (i, 0))

    return pl.pallas_call(
        kernel,
        out_shape=jax.ShapeDtypeStruct((Np, HD), jnp.float32),
        grid_spec=pltpu.PrefetchScalarGridSpec(
            num_scalar_prefetch=1,                   # tile_nnz -> SMEM
            grid=(Np // block_m, Np // block_s),
            in_specs=[q_spec, kv_spec, kv_spec, adj_spec],
            out_specs=o_spec,
            scratch_shapes=[pltpu.VMEM((block_m, num_heads), jnp.float32)],
        ),
        compiler_params=pltpu.CompilerParams(
            dimension_semantics=("parallel", "arbitrary"),
        ),
    )(tile_nnz, q, k, v, adj)


# ----------------------------------------------------------------------------
# Module wrapper: MultiHeadAttentionLayerDfgnnHyper
# ----------------------------------------------------------------------------
class MultiHeadAttentionLayerDfgnnHyperPallas:
    def __init__(self, in_dim, out_dim, num_heads, use_bias, key):
        self.in_dim = in_dim
        self.out_dim = out_dim
        self.num_heads = num_heads
        HD = out_dim * num_heads
        kq, kk, kv, kbq, kbk, kbv = jax.random.split(key, 6)
        bound = 1.0 / math.sqrt(in_dim)
        shape = (in_dim, HD)
        # Synthetic init mirroring nn.Linear's uniform(-1/sqrt(in), 1/sqrt(in)).
        self.Wq = jax.random.uniform(kq, shape, jnp.float32, -bound, bound)
        self.Wk = jax.random.uniform(kk, shape, jnp.float32, -bound, bound)
        self.Wv = jax.random.uniform(kv, shape, jnp.float32, -bound, bound)
        if use_bias:
            self.bq = jax.random.uniform(kbq, (1, HD), jnp.float32, -bound, bound)
            self.bk = jax.random.uniform(kbk, (1, HD), jnp.float32, -bound, bound)
            self.bv = jax.random.uniform(kbv, (1, HD), jnp.float32, -bound, bound)
        else:
            z = jnp.zeros((1, HD), jnp.float32)
            self.bq = self.bk = self.bv = z
        # Fused QKV parameters: one matmul, h read from HBM once.
        self.Wqkv = jnp.concatenate([self.Wq, self.Wk, self.Wv], axis=1)
        self.bqkv = jnp.concatenate([self.bq, self.bk, self.bv], axis=1)

    def __call__(self, adj, h):
        # adj: (N, N) mask, adj[dst, src] != 0 iff edge src->dst (int8/bool/float)
        # h:   (N, in_dim)
        N = h.shape[0]
        H, D = self.num_heads, self.out_dim
        HD = H * D
        # NOTE: HD should be a multiple of 128 for lane-dense packed slabs
        # (the test config uses H*D = 128); other sizes still run, just slower.

        # Pad node count to a multiple of 256 so the dst ("parallel") axis
        # always has >= 2 tiles (megacore on v7x).
        Np = max(256, -(-N // 256) * 256)
        block_m = _pick_tile(Np, (512, 256, 128), max_val=Np // 2)
        block_s = _pick_tile(Np, (1024, 512, 256, 128), max_val=Np)
        block_proj = _pick_tile(Np, (1024, 512, 256, 128), max_val=Np)

        h_p = h if Np == N else jnp.pad(h, ((0, Np - N), (0, 0)))
        adj_i8 = adj.astype(jnp.int8)
        adj_p = adj_i8 if Np == N else jnp.pad(adj_i8,
                                               ((0, Np - N), (0, Np - N)))

        # Per-(dst-tile, src-tile) edge counts -> SMEM scalar prefetch so the
        # kernel can skip empty tiles entirely.
        nI, nS = Np // block_m, Np // block_s
        tile_nnz = jnp.sum(adj_p.reshape(nI, block_m, nS, block_s),
                           axis=(1, 3), dtype=jnp.int32)          # (nI, nS)

        q, k, v = fused_qkv_projection(h_p, self.Wqkv, self.bqkv, HD,
                                       block_m=block_proj)        # bf16 (Np, H*D)
        out = graph_attention(q, k, v, adj_p, tile_nnz, H, D,
                              block_m=block_m, block_s=block_s)   # f32 (Np, H*D)
        out = out[:N].reshape(N, H, D)                            # PyTorch convention
        # TODO(synk): CUDA-event kernel_time has no Pallas equivalent; return 0.0.
        return out, 0.0


# ----------------------------------------------------------------------------
# Pure-JAX reference (same math as the DGL propagate_attention path)
# ----------------------------------------------------------------------------
def reference(adj, h, layer):
    N = h.shape[0]
    H, D = layer.num_heads, layer.out_dim
    Q = (h @ layer.Wq + layer.bq).reshape(N, H, D)
    K = (h @ layer.Wk + layer.bk).reshape(N, H, D)
    V = (h @ layer.Wv + layer.bv).reshape(N, H, D)
    s = jnp.einsum("ihd,jhd->ijh", Q, K) / math.sqrt(D)
    e = jnp.exp(jnp.clip(s, -5.0, 5.0)) * adj[:, :, None]
    z = e.sum(axis=1)                        # (N, H)
    wv = jnp.einsum("ijh,jhd->ihd", e, V)    # (N, H, D)
    return wv / z[:, :, None]


if __name__ == "__main__":
    key = jax.random.PRNGKey(0)
    k_param, k_h, k_adj = jax.random.split(key, 3)

    # Small shapes, chosen so H*D = 128 (lane-dense packed head layout)
    N = 256
    in_dim = 64
    out_dim = 16
    num_heads = 8

    h = jax.random.normal(k_h, (N, in_dim), jnp.float32)

    # Random sparse graph as a dense adjacency mask; add self-loops so every
    # destination node has at least one incoming edge (matches the assumption
    # of the fused DFGNN kernel; the Pallas kernel additionally guards z=0).
    adj_bool = jax.random.uniform(k_adj, (N, N)) < 0.3
    adj_bool = jnp.logical_or(adj_bool, jnp.eye(N, dtype=bool))
    adj_i8 = adj_bool.astype(jnp.int8)
    adj_f32 = adj_bool.astype(jnp.float32)

    layer = MultiHeadAttentionLayerDfgnnHyperPallas(
        in_dim, out_dim, num_heads, use_bias=True, key=k_param
    )

    out, _ = layer(adj_i8, h)
    out = jax.block_until_ready(out)

    ref = reference(adj_f32, h, layer)
    assert out.shape == (N, num_heads, out_dim)
    max_err = float(jnp.max(jnp.abs(out - ref)))
    # bf16 Q/K/V + approx reciprocal -> slightly looser tolerance than f32.
    assert jnp.allclose(out, ref, atol=2e-2, rtol=2e-2), \
        f"mismatch vs reference, max abs err = {max_err}"

    print("KERNEL_OK")
</pallas_src>

<mosaic_0001>
module attributes {stable_mosaic.version = 11 : i64} {
  func.func @_fused_qkv_kernel(%arg0: i32, %arg1: memref<256x64xf32, #tpu.memory_space<vmem>>, %arg2: memref<64x384xf32, #tpu.memory_space<vmem>>, %arg3: memref<1x384xf32, #tpu.memory_space<vmem>>, %arg4: memref<256x128xbf16, #tpu.memory_space<vmem>>, %arg5: memref<256x128xbf16, #tpu.memory_space<vmem>>, %arg6: memref<256x128xbf16, #tpu.memory_space<vmem>>) attributes {dimension_semantics = [#tpu.dimension_semantics<parallel>], iteration_bounds = array<i64: 1>, scalar_prefetch = 0 : i64, scratch_operands = 0 : i64, tpu.core_type = #tpu.core_type<tc>, window_params = [{transform_indices = @transform_0, window_bounds = array<i64: 256, 64>}, {pipeline_mode = #tpu.pipeline_mode<synchronous>, transform_indices = @transform_1, window_bounds = array<i64: 64, 384>}, {pipeline_mode = #tpu.pipeline_mode<synchronous>, transform_indices = @transform_2, window_bounds = array<i64: 1, 384>}, {transform_indices = @transform_3, window_bounds = array<i64: 256, 128>}, {transform_indices = @transform_4, window_bounds = array<i64: 256, 128>}, {transform_indices = @transform_5, window_bounds = array<i64: 256, 128>}]} {
    %c0 = arith.constant 0 : index
    %c0_0 = arith.constant 0 : index
    %0 = vector.load %arg1[%c0, %c0_0] : memref<256x64xf32, #tpu.memory_space<vmem>>, vector<256x64xf32>
    %c0_1 = arith.constant 0 : index
    %c0_2 = arith.constant 0 : index
    %1 = vector.load %arg2[%c0_1, %c0_2] : memref<64x384xf32, #tpu.memory_space<vmem>>, vector<64x384xf32>
    %cst = arith.constant dense<0.000000e+00> : vector<256x384xf32>
    %2 = tpu.matmul %0, %1, %cst {dimension_numbers = #tpu.dot_dimension_numbers<[1], [0], [0], [1], [0, 0, 1, 1], [], []>} : vector<256x64xf32>, vector<64x384xf32>, vector<256x384xf32> -> vector<256x384xf32>
    %c0_3 = arith.constant 0 : index
    %c0_4 = arith.constant 0 : index
    %3 = vector.load %arg3[%c0_3, %c0_4] : memref<1x384xf32, #tpu.memory_space<vmem>>, vector<1x384xf32>
    %4 = vector.broadcast %3 : vector<1x384xf32> to vector<256x384xf32>
    %5 = arith.addf %2, %4 : vector<256x384xf32>
    %6 = vector.extract_strided_slice %5 {offsets = [0, 0], sizes = [256, 128], strides = [1, 1]} : vector<256x384xf32> to vector<256x128xf32>
    %7 = arith.truncf %6 : vector<256x128xf32> to vector<256x128xbf16>
    %c0_5 = arith.constant 0 : index
    %c0_6 = arith.constant 0 : index
    %8 = vector.load %arg4[%c0_5, %c0_6] : memref<256x128xbf16, #tpu.memory_space<vmem>>, vector<256x128xbf16>
    tpu.vector_store %arg4[%c0_5, %c0_6], %7 {strides = array<i32>} : memref<256x128xbf16, #tpu.memory_space<vmem>>, vector<256x128xbf16>,
    %9 = vector.extract_strided_slice %5 {offsets = [0, 128], sizes = [256, 128], strides = [1, 1]} : vector<256x384xf32> to vector<256x128xf32>
    %10 = arith.truncf %9 : vector<256x128xf32> to vector<256x128xbf16>
    %c0_7 = arith.constant 0 : index
    %c0_8 = arith.constant 0 : index
    %11 = vector.load %arg5[%c0_7, %c0_8] : memref<256x128xbf16, #tpu.memory_space<vmem>>, vector<256x128xbf16>
    tpu.vector_store %arg5[%c0_7, %c0_8], %10 {strides = array<i32>} : memref<256x128xbf16, #tpu.memory_space<vmem>>, vector<256x128xbf16>,
    %12 = vector.extract_strided_slice %5 {offsets = [0, 256], sizes = [256, 128], strides = [1, 1]} : vector<256x384xf32> to vector<256x128xf32>
    %13 = arith.truncf %12 : vector<256x128xf32> to vector<256x128xbf16>
    %c0_9 = arith.constant 0 : index
    %c0_10 = arith.constant 0 : index
    %14 = vector.load %arg6[%c0_9, %c0_10] : memref<256x128xbf16, #tpu.memory_space<vmem>>, vector<256x128xbf16>
    tpu.vector_store %arg6[%c0_9, %c0_10], %13 {strides = array<i32>} : memref<256x128xbf16, #tpu.memory_space<vmem>>, vector<256x128xbf16>,
    return
  }
  func.func @transform_0(%arg0: i32) -> (i32, i32) {
    %c0_i32 = arith.constant 0 : i32
    %c0_i32_0 = arith.constant 0 : i32
    return %arg0, %c0_i32 : i32, i32
  }
  func.func @transform_1(%arg0: i32) -> (i32, i32) {
    %c0_i32 = arith.constant 0 : i32
    %c0_i32_0 = arith.constant 0 : i32
    %c0_i32_1 = arith.constant 0 : i32
    return %c0_i32, %c0_i32_0 : i32, i32
  }
  func.func @transform_2(%arg0: i32) -> (i32, i32) {
    %c0_i32 = arith.constant 0 : i32
    %c0_i32_0 = arith.constant 0 : i32
    %c0_i32_1 = arith.constant 0 : i32
    return %c0_i32, %c0_i32_0 : i32, i32
  }
  func.func @transform_3(%arg0: i32) -> (i32, i32) {
    %c0_i32 = arith.constant 0 : i32
    %c0_i32_0 = arith.constant 0 : i32
    return %arg0, %c0_i32 : i32, i32
  }
  func.func @transform_4(%arg0: i32) -> (i32, i32) {
    %c0_i32 = arith.constant 0 : i32
    %c0_i32_0 = arith.constant 0 : i32
    return %arg0, %c0_i32 : i32, i32
  }
  func.func @transform_5(%arg0: i32) -> (i32, i32) {
    %c0_i32 = arith.constant 0 : i32
    %c0_i32_0 = arith.constant 0 : i32
    return %arg0, %c0_i32 : i32, i32
  }
}

</mosaic_0001>

<bundles_post_ra>
// kernel: tpu_custom_call.1
= control target key start
LH: loop header
LB: loop body
LE: loop exit
PB: predicated region body
PF: predicated region fallthrough
CT: control target
= control target key end

     0   :  { %11 = vsyncpa [#allocation3], 0  ;;  %v1959_v7 = vmov 0.0   ;;  %vm92_vm0 = vcmask 523264   ;;  %s2469_s0 = inlined_call_operand.vmem [shape: f32[256,64], index: 0, kind: input, shape index: {}]   ;;  %s2470_s1 = inlined_call_operand.vmem [shape: f32[64,384], index: 1, kind: input, shape index: {}]   ;;  %s2471_s2 = inlined_call_operand.vmem [shape: f32[1,384], index: 2, kind: input, shape index: {}]   ;;  %s2472_s3 = inlined_call_operand.hbm [shape: bf16[256,128], index: 3, kind: output, shape index: {0}]   ;;  %s2473_s4 = inlined_call_operand.hbm [shape: bf16[256,128], index: 4, kind: output, shape index: {1}]   ;;  %s2474_s5 = inlined_call_operand.hbm [shape: bf16[256,128], index: 5, kind: output, shape index: {2}]  }
   0x1   :  { %v52_v0 = vld [vmem:[%s2470_s1 + $0x8] sm:$0xff]  ;;  %v55_v1 = vld [vmem:[%s2470_s1 + $0x20] sm:$0xff]  ;;  %v54_v4 = vld [vmem:[%s2470_s1 + $0x18] sm:$0xff]  ;;  %253 = vmatprep.mubr.f32.mxu0 %v1959_v7  ;;  %397 = vmatprep.mubr.f32.mxu1 %v1959_v7 }
   0x2   :  { %v51_v2 = vld [vmem:[%s2470_s1] sm:$0xff]  ;;  %v1843_v3 = vpack.c.bf16 %v55_v1, %v52_v0  ;;  %v58_v5 = vld [vmem:[%s2470_s1 + $0x38] sm:$0xff]  ;;  %v61_v6 = vld [vmem:[%s2470_s1 + $0x50] sm:$0xff] }
   0x3   :  { %v1845_v8 = vpack.c.bf16 %v54_v4, %v51_v2  ;;  %v1847_v9 = vpack.c.bf16 %v61_v6, %v58_v5  ;;  %v57_v10 = vld [vmem:[%s2470_s1 + $0x30] sm:$0xff]  ;;  %v60_v11 = vld [vmem:[%s2470_s1 + $0x48] sm:$0xff]  ;;  %v67_v13 = vld [vmem:[%s2470_s1 + $0x80] sm:$0xff] }
   0x4   :  { %v64_v12 = vld [vmem:[%s2470_s1 + $0x68] sm:$0xff]  ;;  %1844 = vmatprep.subr.bf16.mxu0 %v1843_v3  ;;  %1875 = vmatprep.subr.bf16.mxu1 %v1843_v3  ;;  %v1849_v14 = vpack.c.bf16 %v60_v11, %v57_v10  ;;  %v63_v16 = vld [vmem:[%s2470_s1 + $0x60] sm:$0xff]  ;;  %v66_v17 = vld [vmem:[%s2470_s1 + $0x78] sm:$0xff] }
   0x5   :  { %1846 = vmatpush1.bf16.msra.mxu0 %v1845_v8  ;;  %1879 = vmatpush1.bf16.msra.mxu1 %v1845_v8  ;;  %v1851_v15 = vpack.c.bf16 %v67_v13, %v64_v12  ;;  %v70_v18 = vld [vmem:[%s2470_s1 + $0x98] sm:$0xff]  ;;  %v73_v19 = vld [vmem:[%s2470_s1 + $0xb0] sm:$0xff]  ;;  %v1853_v20 = vpack.c.bf16 %v66_v17, %v63_v16  ;;  %v72_v23 = vld [vmem:[%s2470_s1 + $0xa8] sm:$0xff] }
   0x6   :  { %1848 = vmatprep.subr.bf16.mxu0 %v1847_v9  ;;  %1876 = vmatprep.subr.bf16.mxu1 %v1847_v9  ;;  %v1855_v21 = vpack.c.bf16 %v73_v19, %v70_v18  ;;  %v69_v22 = vld [vmem:[%s2470_s1 + $0x90] sm:$0xff]  ;;  %v56_v25 = vld [vmem:[%s2470_s1 + $0x28] sm:$0xff]  ;;  %v59_v28 = vld [vmem:[%s2470_s1 + $0x40] sm:$0xff] }
   0x7   :  { %v53_v24 = vld [vmem:[%s2470_s1 + $0x10] sm:$0xff]  ;;  %v1857_v26 = vpack.c.bf16 %v72_v23, %v69_v22  ;;  %v62_v29 = vld [vmem:[%s2470_s1 + $0x58] sm:$0xff]  ;;  %v2060_v30 = vld [vmem:[%s2469_s0] sm:$0xff] }
   0x8   :  { %v1859_v27 = vpack.c.bf16 %v56_v25, %v53_v24  ;;  %v2065_v31 = vld [vmem:[%s2469_s0 + $0xc0] sm:$0xff]  ;;  %v1863_v32 = vpack.c.bf16 %v62_v29, %v59_v28  ;;  %v65_v33 = vld [vmem:[%s2470_s1 + $0x70] sm:$0xff]  ;;  %v68_v34 = vld [vmem:[%s2470_s1 + $0x88] sm:$0xff] }
   0x9   :  { %1850 = vmatpush1.bf16.msra.mxu0 %v1849_v14  ;;  %1880 = vmatpush1.bf16.msra.mxu1 %v1849_v14 }
   0xa   :  { %1852 = vmatprep.subr.bf16.mxu0 %v1851_v15  ;;  %1877 = vmatprep.subr.bf16.mxu1 %v1851_v15 }
   0xd   :  { %1854 = vmatpush1.bf16.msra.mxu0 %v1853_v20  ;;  %1881 = vmatpush1.bf16.msra.mxu1 %v1853_v20 }
   0xe   :  { %1856 = vmatprep.subr.bf16.mxu0 %v1855_v21  ;;  %1878 = vmatprep.subr.bf16.mxu1 %v1855_v21 }
  0x11   :  { %1858 = vmatpush1.bf16.msra.mxu0 %v1857_v26  ;;  %1882 = vmatpush1.bf16.msra.mxu1 %v1857_v26 }
  0x12   :  { %1860 = vmatprep.subr.bf16.mxu1 %v1859_v27 }
  0x14   :  { %1198 = vmatmul.mubr.msk.f32.vlgmr.msra.gmra.mrb[0].mxu0 %vm92_vm0, %v2060_v30  ;;  %1222 = vmatmul.mubr.msk.f32.vlgmr.msra.gmra.mrb[0].mxu1 %vm92_vm0, %v2065_v31 }
  0x15   :  { %12 = vsyncpa [#allocation5], 0  ;;  %1862 = vmatpush3.bf16.msra.mxu1 %v1859_v27  ;;  %259 = vmatprep.mubr.f32.mxu0 %v1959_v7  ;;  %v20_v35 = vld [vmem:[%s2469_s0 + $0x8] sm:$0xff]  ;;  %v1867_v37 = vpack.c.bf16 %v68_v34, %v65_v33  ;;  %v71_v38 = vld [vmem:[%s2470_s1 + $0xa0] sm:$0xff]  ;;  %v77_v5 = vlaneseq  ;;  %s1961_s29 = smov [#allocation4]   ;;  %s1962_s6 = smov [#allocation6]  }
  0x16   :  { %v2084_v36 = vld [vmem:[%s2469_s0 + $0xc8] sm:$0xff]  ;;  %403 = vmatprep.mubr.f32.mxu1 %v1959_v7  ;;  %1864 = vmatprep.subr.bf16.mxu1 %v1863_v32  ;;  %v74_v39 = vld [vmem:[%s2470_s1 + $0xb8] sm:$0xff]  ;;  %v21_v40 = vld [vmem:[%s2469_s0 + $0x10] sm:$0xff]  ;;  %s1168_s30 = sshll.u32 %s1961_s29, 4  ;;  %s1180_s7 = sshll.u32 %s1962_s6, 4  ;;  %s2410_s30 = int_to_ptr.vmem [resolvable:$true] %s1168_s30  ;;  %s2412_s7 = int_to_ptr.vmem [resolvable:$true] %s1180_s7 }
  0x17   :  { %v2104_v41 = vld [vmem:[%s2469_s0 + $0xd0] sm:$0xff]  ;;  %v1871_v42 = vpack.c.bf16 %v74_v39, %v71_v38  ;;  %v22_v43 = vld [vmem:[%s2469_s0 + $0x18] sm:$0xff]  ;;  %v23_v45 = vld [vmem:[%s2469_s0 + $0x20] sm:$0xff]  ;;  %v2295_v6 = vshrl.u32 %v77_v5, 7 }
  0x18   :  { %1199 = vmatmul.mubr.msk.f32.gmra.mrb[2].mxu0 %vm92_vm0, %v20_v35  ;;  %1223 = vmatmul.mubr.msk.f32.gmra.mrb[2].mxu1 %vm92_vm0, %v2084_v36  ;;  %v2117_v44 = vld [vmem:[%s2469_s0 + $0xd8] sm:$0xff]  ;;  %v2130_v46 = vld [vmem:[%s2469_s0 + $0xe0] sm:$0xff]  ;;  %v24_v47 = vld [vmem:[%s2469_s0 + $0x28] sm:$0xff] }
  0x19   :  { %265 = vmatprep.mubr.f32.mxu0 %v1959_v7  ;;  %409 = vmatprep.mubr.f32.mxu1 %v1959_v7  ;;  %v2143_v48 = vld [vmem:[%s2469_s0 + $0xe8] sm:$0xff]  ;;  %v25_v49 = vld [vmem:[%s2469_s0 + $0x30] sm:$0xff]  ;;  %v26_v51 = vld [vmem:[%s2469_s0 + $0x38] sm:$0xff]  ;;  %v79_v8 = vsub.s32 0, %v2295_v6 }
  0x1a   :  { %1866 = vmatpush3.bf16.msra.mxu1 %v1863_v32  ;;  %v2156_v50 = vld [vmem:[%s2469_s0 + $0xf0] sm:$0xff]  ;;  %v2169_v52 = vld [vmem:[%s2469_s0 + $0xf8] sm:$0xff]  ;;  %v27_v53 = vld [vmem:[%s2469_s0 + $0x40] sm:$0xff] }
  0x1b   :  { %1868 = vmatprep.subr.bf16.mxu1 %v1867_v37  ;;  %v28_v54 = vld [vmem:[%s2469_s0 + $0x48] sm:$0xff]  ;;  %v29_v55 = vld [vmem:[%s2469_s0 + $0x50] sm:$0xff]  ;;  %v30_v56 = vld [vmem:[%s2469_s0 + $0x58] sm:$0xff] }
  0x1c   :  { %1200 = vmatmul.mubr.msk.f32.gmra.mrb[4].mxu0 %vm92_vm0, %v21_v40  ;;  %1224 = vmatmul.mubr.msk.f32.gmra.mrb[4].mxu1 %vm92_vm0, %v2104_v41  ;;  %v31_v57 = vld [vmem:[%s2469_s0 + $0x60] sm:$0xff]  ;;  %v32_v58 = vld [vmem:[%s2469_s0 + $0x68] sm:$0xff]  ;;  %v33_v59 = vld [vmem:[%s2469_s0 + $0x70] sm:$0xff] }
  0x1d   :  { %271 = vmatprep.mubr.f32.mxu0 %v1959_v7  ;;  %415 = vmatprep.mubr.f32.mxu1 %v1959_v7  ;;  %v34_v60 = vld [vmem:[%s2469_s0 + $0x78] sm:$0xff]  ;;  %v35_v61 = vld [vmem:[%s2469_s0 + $0x80] sm:$0xff]  ;;  %v36_v62 = vld [vmem:[%s2469_s0 + $0x88] sm:$0xff] }
  0x1e   :  { %1870 = vmatpush3.bf16.msra.mxu1 %v1867_v37  ;;  %v37_v63 = vld [vmem:[%s2469_s0 + $0x90] sm:$0xff]  ;;  %v38_v0 = vld [vmem:[%s2469_s0 + $0x98] sm:$0xff]  ;;  %v39_v1 = vld [vmem:[%s2469_s0 + $0xa0] sm:$0xff] }
  0x1f   :  { %1872 = vmatprep.subr.bf16.mxu1 %v1871_v42  ;;  %v40_v2 = vld [vmem:[%s2469_s0 + $0xa8] sm:$0xff]  ;;  %v41_v3 = vld [vmem:[%s2469_s0 + $0xb0] sm:$0xff]  ;;  %v42_v4 = vld [vmem:[%s2469_s0 + $0xb8] sm:$0xff] }
  0x20   :  { %1201 = vmatmul.mubr.msk.f32.gmra.mrb[6].mxu0 %vm92_vm0, %v22_v43  ;;  %1225 = vmatmul.mubr.msk.f32.gmra.mrb[6].mxu1 %vm92_vm0, %v2117_v44  ;;  %v2301_v9 = vld [vmem:[%s2471_s2] sm:$0x7]  ;;  %s1960_s2 = smov [#allocation2]  }
  0x21   :  { %277 = vmatprep.mubr.f32.mxu0 %v1959_v7  ;;  %421 = vmatprep.mubr.f32.mxu1 %v1959_v7  ;;  %v2305_v12 = vrot.slane %v2301_v9, %v79_v8  ;;  %s1156_s28 = sshll.u32 %s1960_s2, 4  ;;  %s1157_s28 = int_to_ptr.vmem [resolvable:$true] %s1156_s28 }
  0x22   :  { %1874 = vmatpush3.bf16.msra.mxu1 %v1871_v42  ;;  %s1889_s8 = scalar_lea.vmem %s1157_s28, 2048  ;;  %p1894_p1 = scmp.lt.s32.totalorder %s1157_s28, %s1157_s28 }
  0x23   :  { %p1890_p0 = scmp.ne.s32.totalorder %s1157_s28, %s1889_s8  ;;  %p1895_p2 = scmp.lt.s32.totalorder %s1889_s8, %s1889_s8 }
  0x24   :  { %1202 = vmatmul.mubr.msk.f32.gmra.mrb[8].mxu0 %vm92_vm0, %v23_v45  ;;  %1226 = vmatmul.mubr.msk.f32.gmra.mrb[8].mxu1 %vm92_vm0, %v2130_v46 }
  0x25   :  { %283 = vmatprep.mubr.f32.mxu0 %v1959_v7  ;;  %427 = vmatprep.mubr.f32.mxu1 %v1959_v7  ;;  %p1896_p3 = por %p1895_p2, %p1894_p1 }
  0x27   :  { %p1897_p4 = pnand %p1896_p3, %p1890_p0 }
  0x28   :  { %1203 = vmatmul.mubr.msk.f32.gmra.mrb[10].mxu0 %vm92_vm0, %v24_v47  ;;  %1227 = vmatmul.mubr.msk.f32.gmra.mrb[10].mxu1 %vm92_vm0, %v2143_v48 }
  0x29   :  { %289 = vmatprep.mubr.f32.mxu0 %v1959_v7  ;;  %433 = vmatprep.mubr.f32.mxu1 %v1959_v7 }
  0x2c   :  { %1204 = vmatmul.mubr.msk.f32.gmra.mrb[12].mxu0 %vm92_vm0, %v25_v49  ;;  %1228 = vmatmul.mubr.msk.f32.gmra.mrb[12].mxu1 %vm92_vm0, %v2156_v50 }
  0x2d   :  { %295 = vmatprep.mubr.f32.mxu0 %v1959_v7  ;;  %439 = vmatprep.mubr.f32.mxu1 %v1959_v7 }
  0x30   :  { %1205 = vmatmul.mubr.msk.f32.gmra.mrb[14].mxu0 %vm92_vm0, %v26_v51  ;;  %1229 = vmatmul.mubr.msk.f32.gmra.mrb[14].mxu1 %vm92_vm0, %v2169_v52 }
  0x31   :  { %301 = vmatprep.mubr.f32.mxu0 %v1959_v7  ;;  %1795 = vmatprep.mubr.msk.f32.mxu1 %vm92_vm0, %v2060_v30 }
  0x34   :  { %1206 = vmatmul.mubr.msk.f32.gmra.mrb[16].mxu0 %vm92_vm0, %v27_v53  ;;  %1796 = vmatmul.mubr.msk.f32.vlgmr.msra.gmra.mrb[16].mxu1 %vm92_vm0, %v20_v35 }
  0x35   :  { %307 = vmatprep.mubr.f32.mxu0 %v1959_v7  ;;  %1798 = vmatprep.mubr.msk.f32.mxu1 %vm92_vm0, %v21_v40 }
  0x38   :  { %1207 = vmatmul.mubr.msk.f32.gmra.mrb[18].mxu0 %vm92_vm0, %v28_v54  ;;  %1799 = vmatmul.mubr.msk.f32.gmra.mrb[18].mxu1 %vm92_vm0, %v22_v43 }
  0x39   :  { %313 = vmatprep.mubr.f32.mxu0 %v1959_v7  ;;  %1801 = vmatprep.mubr.msk.f32.mxu1 %vm92_vm0, %v23_v45 }
  0x3c   :  { %1208 = vmatmul.mubr.msk.f32.gmra.mrb[20].mxu0 %vm92_vm0, %v29_v55  ;;  %1802 = vmatmul.mubr.msk.f32.gmra.mrb[20].mxu1 %vm92_vm0, %v24_v47 }
  0x3d   :  { %319 = vmatprep.mubr.f32.mxu0 %v1959_v7  ;;  %1804 = vmatprep.mubr.msk.f32.mxu1 %vm92_vm0, %v25_v49 }
  0x40   :  { %1209 = vmatmul.mubr.msk.f32.gmra.mrb[22].mxu0 %vm92_vm0, %v30_v56  ;;  %1805 = vmatmul.mubr.msk.f32.gmra.mrb[22].mxu1 %vm92_vm0, %v26_v51 }
  0x41   :  { %325 = vmatprep.mubr.f32.mxu0 %v1959_v7  ;;  %1807 = vmatprep.mubr.msk.f32.mxu1 %vm92_vm0, %v27_v53 }
  0x44   :  { %1210 = vmatmul.mubr.msk.f32.gmra.mrb[24].mxu0 %vm92_vm0, %v31_v57  ;;  %1808 = vmatmul.mubr.msk.f32.gmra.mrb[24].mxu1 %vm92_vm0, %v28_v54 }
  0x45   :  { %331 = vmatprep.mubr.f32.mxu0 %v1959_v7  ;;  %1810 = vmatprep.mubr.msk.f32.mxu1 %vm92_vm0, %v29_v55 }
  0x48   :  { %1211 = vmatmul.mubr.msk.f32.gmra.mrb[26].mxu0 %vm92_vm0, %v32_v58  ;;  %1811 = vmatmul.mubr.msk.f32.gmra.mrb[26].mxu1 %vm92_vm0, %v30_v56 }
  0x49   :  { %337 = vmatprep.mubr.f32.mxu0 %v1959_v7  ;;  %1813 = vmatprep.mubr.msk.f32.mxu1 %vm92_vm0, %v31_v57 }
  0x4c   :  { %1212 = vmatmul.mubr.msk.f32.gmra.mrb[28].mxu0 %vm92_vm0, %v33_v59  ;;  %1814 = vmatmul.mubr.msk.f32.gmra.mrb[28].mxu1 %vm92_vm0, %v32_v58 }
  0x4d   :  { %343 = vmatprep.mubr.f32.mxu0 %v1959_v7  ;;  %1816 = vmatprep.mubr.msk.f32.mxu1 %vm92_vm0, %v33_v59 }
  0x50   :  { %1213 = vmatmul.mubr.msk.f32.gmra.mrb[30].mxu0 %vm92_vm0, %v34_v60  ;;  %1817 = vmatmul.mubr.msk.f32.gmra.mrb[30].mxu1 %vm92_vm0, %v34_v60 }
  0x51   :  { %349 = vmatprep.mubr.f32.mxu0 %v1959_v7  ;;  %1819 = vmatprep.mubr.msk.f32.mxu1 %vm92_vm0, %v35_v61 }
  0x54   :  { %1214 = vmatmul.mubr.msk.f32.gmra.mrb[32].mxu0 %vm92_vm0, %v35_v61  ;;  %1820 = vmatmul.mubr.msk.f32.gmra.mrb[32].mxu1 %vm92_vm0, %v36_v62 }
  0x55   :  { %355 = vmatprep.mubr.f32.mxu0 %v1959_v7  ;;  %1822 = vmatprep.mubr.msk.f32.mxu1 %vm92_vm0, %v37_v63 }
  0x58   :  { %1215 = vmatmul.mubr.msk.f32.gmra.mrb[34].mxu0 %vm92_vm0, %v36_v62  ;;  %1823 = vmatmul.mubr.msk.f32.gmra.mrb[34].mxu1 %vm92_vm0, %v38_v0 }
  0x59   :  { %361 = vmatprep.mubr.f32.mxu0 %v1959_v7  ;;  %1825 = vmatprep.mubr.msk.f32.mxu1 %vm92_vm0, %v39_v1 }
  0x5c   :  { %1216 = vmatmul.mubr.msk.f32.gmra.mrb[36].mxu0 %vm92_vm0, %v37_v63  ;;  %1826 = vmatmul.mubr.msk.f32.gmra.mrb[36].mxu1 %vm92_vm0, %v40_v2 }
  0x5d   :  { %367 = vmatprep.mubr.f32.mxu0 %v1959_v7  ;;  %1828 = vmatprep.mubr.msk.f32.mxu1 %vm92_vm0, %v41_v3 }
  0x60   :  { %1217 = vmatmul.mubr.msk.f32.gmra.mrb[38].mxu0 %vm92_vm0, %v38_v0  ;;  %1829 = vmatmul.mubr.msk.f32.gmra.mrb[38].mxu1 %vm92_vm0, %v42_v4 }
  0x61   :  { %373 = vmatprep.mubr.f32.mxu0 %v1959_v7  ;;  %1831 = vmatprep.mubr.msk.f32.mxu1 %vm92_vm0, %v2065_v31 }
  0x64   :  { %1218 = vmatmul.mubr.msk.f32.gmra.mrb[40].mxu0 %vm92_vm0, %v39_v1  ;;  %1832 = vmatmul.mubr.msk.f32.gmra.mrb[40].mxu1 %vm92_vm0, %v2084_v36 }
  0x65   :  { %379 = vmatprep.mubr.f32.mxu0 %v1959_v7  ;;  %1834 = vmatprep.mubr.msk.f32.mxu1 %vm92_vm0, %v2104_v41 }
  0x68   :  { %1219 = vmatmul.mubr.msk.f32.gmra.mrb[42].mxu0 %vm92_vm0, %v40_v2  ;;  %1835 = vmatmul.mubr.msk.f32.gmra.mrb[42].mxu1 %vm92_vm0, %v2117_v44 }
  0x69   :  { %385 = vmatprep.mubr.f32.mxu0 %v1959_v7  ;;  %1837 = vmatprep.mubr.msk.f32.mxu1 %vm92_vm0, %v2130_v46 }
  0x6c   :  { %1220 = vmatmul.mubr.msk.f32.gmra.mrb[44].mxu0 %vm92_vm0, %v41_v3  ;;  %1838 = vmatmul.mubr.msk.f32.gmra.mrb[44].mxu1 %vm92_vm0, %v2143_v48 }
  0x6d   :  { %391 = vmatprep.mubr.f32.mxu0 %v1959_v7  ;;  %1840 = vmatprep.mubr.msk.f32.mxu1 %vm92_vm0, %v2156_v50  ;;  %v83_v7 = vsub.s32 1, %v2295_v6 }
  0x6f   :  { %v2308_v15 = vrot.slane %v2301_v9, %v83_v7 }
  0x70   :  { %1221 = vmatmul.mubr.msk.f32.gmra.mrb[46].mxu0 %vm92_vm0, %v42_v4  ;;  %1841 = vmatmul.mubr.msk.f32.gmra.mrb[46].mxu1 %vm92_vm0, %v2169_v52 }
  0xe7   :  { %v255_v10 = vpop.f32.mrb[0].mxu0  ;;  %v399_v11 = vpop.f32.mrb[0].mxu1 }
  0xe8   :  { %v257_v13 = vpop.f32.mrb[1].mxu0  ;;  %v401_v14 = vpop.f32.mrb[1].mxu1  ;;  %v256_v18 = vadd.f32 %v255_v10, %v2305_v12  ;;  %v400_v19 = vadd.f32 %v399_v11, %v2305_v12 }
  0xe9   :  { %v258_v24 = vadd.f32 %v257_v13, %v2308_v15  ;;  %v402_v25 = vadd.f32 %v401_v14, %v2308_v15  ;;  %v87_v13 = vsub.s32 2, %v2295_v6 }
  0xeb   :  { %v261_v16 = vpop.f32.mrb[2].mxu0  ;;  %v405_v17 = vpop.f32.mrb[2].mxu1 }
  0xec   :  { %v262_v20 = vadd.f32 %v261_v16, %v2305_v12  ;;  %v406_v21 = vadd.f32 %v405_v17, %v2305_v12  ;;  %v263_v22 = vpop.f32.mrb[3].mxu0  ;;  %v407_v23 = vpop.f32.mrb[3].mxu1 }
  0xed   :  { %v264_v26 = vadd.f32 %v263_v22, %v2308_v15  ;;  %v408_v27 = vadd.f32 %v407_v23, %v2308_v15 }
  0xee   :  { %v1457_v28 = vpack.c.bf16 %v262_v20, %v256_v18  ;;  %v1517_v29 = vpack.c.bf16 %v406_v21, %v400_v19  ;;  %v2336_v19 = vrot.slane %v2301_v9, %v87_v13 }
  0xef   :  { %v1537_v30 = vpack.c.bf16 %v264_v26, %v258_v24  ;;  %v1597_v31 = vpack.c.bf16 %v408_v27, %v402_v25  ;;  %v267_v32 = vpop.f32.mrb[4].mxu0  ;;  %v411_v33 = vpop.f32.mrb[4].mxu1 }
  0xf0   :  { %1458 = vst [vmem:[#allocation2] sm:$0xff] %v1457_v28   ;;  %1705 = vst [vmem:[#allocation2 + $0x60] sm:$0xff] %v1517_v29   ;;  %v269_v34 = vpop.f32.mrb[5].mxu0  ;;  %v413_v35 = vpop.f32.mrb[5].mxu1  ;;  %v268_v38 = vadd.f32 %v267_v32, %v2305_v12  ;;  %v412_v39 = vadd.f32 %v411_v33, %v2305_v12 }
  0xf1   :  { %1538 = vst [vmem:[#allocation4] sm:$0xff] %v1537_v30   ;;  %1720 = vst [vmem:[#allocation4 + $0x60] sm:$0xff] %v1597_v31   ;;  %v270_v44 = vadd.f32 %v269_v34, %v2308_v15  ;;  %v414_v45 = vadd.f32 %v413_v35, %v2308_v15 }
  0xf3   :  { %v273_v36 = vpop.f32.mrb[6].mxu0  ;;  %v417_v37 = vpop.f32.mrb[6].mxu1 }
  0xf4   :  { %v274_v40 = vadd.f32 %v273_v36, %v2305_v12  ;;  %v418_v41 = vadd.f32 %v417_v37, %v2305_v12  ;;  %v275_v42 = vpop.f32.mrb[7].mxu0  ;;  %v419_v43 = vpop.f32.mrb[7].mxu1 }
  0xf5   :  { %v276_v46 = vadd.f32 %v275_v42, %v2308_v15  ;;  %v420_v47 = vadd.f32 %v419_v43, %v2308_v15 }
  0xf6   :  { %v1462_v48 = vpack.c.bf16 %v274_v40, %v268_v38  ;;  %v1522_v49 = vpack.c.bf16 %v418_v41, %v412_v39 }
  0xf7   :  { %v1542_v50 = vpack.c.bf16 %v276_v46, %v270_v44  ;;  %v1602_v51 = vpack.c.bf16 %v420_v47, %v414_v45  ;;  %v279_v52 = vpop.f32.mrb[8].mxu0  ;;  %v423_v53 = vpop.f32.mrb[8].mxu1 }
  0xf8   :  { %1694 = vst [vmem:[#allocation2 + $0x8] sm:$0xff] %v1462_v48   ;;  %1706 = vst [vmem:[#allocation2 + $0x68] sm:$0xff] %v1522_v49   ;;  %v281_v54 = vpop.f32.mrb[9].mxu0  ;;  %v425_v55 = vpop.f32.mrb[9].mxu1  ;;  %v280_v58 = vadd.f32 %v279_v52, %v2305_v12  ;;  %v424_v59 = vadd.f32 %v423_v53, %v2305_v12 }
  0xf9   :  { %1709 = vst [vmem:[#allocation4 + $0x8] sm:$0xff] %v1542_v50   ;;  %1721 = vst [vmem:[#allocation4 + $0x68] sm:$0xff] %v1602_v51   ;;  %v282_v0 = vadd.f32 %v281_v54, %v2308_v15  ;;  %v426_v1 = vadd.f32 %v425_v55, %v2308_v15 }
  0xfb   :  { %v285_v56 = vpop.f32.mrb[10].mxu0  ;;  %v429_v57 = vpop.f32.mrb[10].mxu1 }
  0xfc   :  { %v286_v60 = vadd.f32 %v285_v56, %v2305_v12  ;;  %v430_v61 = vadd.f32 %v429_v57, %v2305_v12  ;;  %v287_v62 = vpop.f32.mrb[11].mxu0  ;;  %v431_v63 = vpop.f32.mrb[11].mxu1 }
  0xfd   :  { %v288_v2 = vadd.f32 %v287_v62, %v2308_v15  ;;  %v432_v3 = vadd.f32 %v431_v63, %v2308_v15 }
  0xfe   :  { %v1467_v4 = vpack.c.bf16 %v286_v60, %v280_v58  ;;  %v1527_v5 = vpack.c.bf16 %v430_v61, %v424_v59 }
  0xff   :  { %v1547_v8 = vpack.c.bf16 %v288_v2, %v282_v0  ;;  %v1607_v7 = vpack.c.bf16 %v432_v3, %v426_v1  ;;  %v291_v10 = vpop.f32.mrb[12].mxu0  ;;  %v435_v11 = vpop.f32.mrb[12].mxu1 }
 0x100   :  { %1695 = vst [vmem:[#allocation2 + $0x10] sm:$0xff] %v1467_v4   ;;  %1707 = vst [vmem:[#allocation2 + $0x70] sm:$0xff] %v1527_v5   ;;  %v293_v14 = vpop.f32.mrb[13].mxu0  ;;  %v437_v16 = vpop.f32.mrb[13].mxu1  ;;  %v292_v20 = vadd.f32 %v291_v10, %v2305_v12  ;;  %v436_v21 = vadd.f32 %v435_v11, %v2305_v12 }
 0x101   :  { %1710 = vst [vmem:[#allocation4 + $0x10] sm:$0xff] %v1547_v8   ;;  %1722 = vst [vmem:[#allocation4 + $0x70] sm:$0xff] %v1607_v7   ;;  %v294_v25 = vadd.f32 %v293_v14, %v2308_v15  ;;  %v438_v26 = vadd.f32 %v437_v16, %v2308_v15 }
 0x103   :  { %v297_v17 = vpop.f32.mrb[14].mxu0  ;;  %v441_v18 = vpop.f32.mrb[14].mxu1 }
 0x104   :  { %v298_v22 = vadd.f32 %v297_v17, %v2305_v12  ;;  %v442_v23 = vadd.f32 %v441_v18, %v2305_v12  ;;  %v299_v6 = vpop.f32.mrb[15].mxu0  ;;  %v443_v24 = vpop.f32.mrb[15].mxu1 }
 0x105   :  { %v300_v27 = vadd.f32 %v299_v6, %v2308_v15  ;;  %v444_v28 = vadd.f32 %v443_v24, %v2308_v15 }
 0x106   :  { %v1472_v9 = vpack.c.bf16 %v298_v22, %v292_v20  ;;  %v1532_v29 = vpack.c.bf16 %v442_v23, %v436_v21 }
 0x107   :  { %v1552_v30 = vpack.c.bf16 %v300_v27, %v294_v25  ;;  %v1612_v31 = vpack.c.bf16 %v444_v28, %v438_v26  ;;  %v303_v32 = vpop.f32.mrb[16].mxu0  ;;  %v1797_v33 = vpop.f32.mrb[16].mxu1 }
 0x108   :  { %1696 = vst [vmem:[#allocation2 + $0x18] sm:$0xff] %v1472_v9   ;;  %1708 = vst [vmem:[#allocation2 + $0x78] sm:$0xff] %v1532_v29   ;;  %v518_v34 = vadd.f32 %v1797_v33, %v2336_v19  ;;  %v305_v35 = vpop.f32.mrb[17].mxu0  ;;  %v512_v36 = vpop.f32.mrb[17].mxu1  ;;  %v304_v41 = vadd.f32 %v303_v32, %v2305_v12 }
 0x109   :  { %1711 = vst [vmem:[#allocation4 + $0x18] sm:$0xff] %v1552_v30   ;;  %1723 = vst [vmem:[#allocation4 + $0x78] sm:$0xff] %v1612_v31   ;;  %v513_v37 = vadd.f32 %v512_v36, %v2336_v19  ;;  %v306_v46 = vadd.f32 %v305_v35, %v2308_v15 }
 0x10b   :  { %v1617_v38 = vpack.c.bf16 %v518_v34, %v513_v37  ;;  %v309_v39 = vpop.f32.mrb[18].mxu0  ;;  %v1800_v40 = vpop.f32.mrb[18].mxu1 }
 0x10c   :  { %v310_v42 = vadd.f32 %v309_v39, %v2305_v12  ;;  %v528_v43 = vadd.f32 %v1800_v40, %v2336_v19  ;;  %v311_v44 = vpop.f32.mrb[19].mxu0  ;;  %v522_v45 = vpop.f32.mrb[19].mxu1 }
 0x10d   :  { %1618 = vst [vmem:[#allocation6] sm:$0xff] %v1617_v38   ;;  %v312_v47 = vadd.f32 %v311_v44, %v2308_v15  ;;  %v523_v48 = vadd.f32 %v522_v45, %v2336_v19 }
 0x10e   :  { %v1477_v49 = vpack.c.bf16 %v310_v42, %v304_v41 }
 0x10f   :  { %v1557_v50 = vpack.c.bf16 %v312_v47, %v306_v46  ;;  %v1622_v51 = vpack.c.bf16 %v528_v43, %v523_v48  ;;  %v315_v52 = vpop.f32.mrb[20].mxu0  ;;  %v1803_v53 = vpop.f32.mrb[20].mxu1 }
 0x110   :  { %1697 = vst [vmem:[#allocation2 + $0x20] sm:$0xff] %v1477_v49   ;;  %v538_v54 = vadd.f32 %v1803_v53, %v2336_v19  ;;  %v317_v55 = vpop.f32.mrb[21].mxu0  ;;  %v532_v56 = vpop.f32.mrb[21].mxu1  ;;  %v316_v61 = vadd.f32 %v315_v52, %v2305_v12 }
 0x111   :  { %1712 = vst [vmem:[#allocation4 + $0x20] sm:$0xff] %v1557_v50   ;;  %1724 = vst [vmem:[#allocation6 + $0x8] sm:$0xff] %v1622_v51   ;;  %v533_v57 = vadd.f32 %v532_v56, %v2336_v19  ;;  %v318_v2 = vadd.f32 %v317_v55, %v2308_v15 }
 0x113   :  { %v1627_v58 = vpack.c.bf16 %v538_v54, %v533_v57  ;;  %v321_v59 = vpop.f32.mrb[22].mxu0  ;;  %v1806_v60 = vpop.f32.mrb[22].mxu1 }
 0x114   :  { %v322_v62 = vadd.f32 %v321_v59, %v2305_v12  ;;  %v548_v63 = vadd.f32 %v1806_v60, %v2336_v19  ;;  %v323_v0 = vpop.f32.mrb[23].mxu0  ;;  %v542_v1 = vpop.f32.mrb[23].mxu1 }
 0x115   :  { %1725 = vst [vmem:[#allocation6 + $0x10] sm:$0xff] %v1627_v58   ;;  %v324_v3 = vadd.f32 %v323_v0, %v2308_v15  ;;  %v543_v4 = vadd.f32 %v542_v1, %v2336_v19 }
 0x116   :  { %v1482_v5 = vpack.c.bf16 %v322_v62, %v316_v61 }
 0x117   :  { %v1562_v8 = vpack.c.bf16 %v324_v3, %v318_v2  ;;  %v1632_v7 = vpack.c.bf16 %v548_v63, %v543_v4  ;;  %v327_v10 = vpop.f32.mrb[24].mxu0  ;;  %v1809_v11 = vpop.f32.mrb[24].mxu1 }
 0x118   :  { %1698 = vst [vmem:[#allocation2 + $0x28] sm:$0xff] %v1482_v5   ;;  %v558_v13 = vadd.f32 %v1809_v11, %v2336_v19  ;;  %v329_v14 = vpop.f32.mrb[25].mxu0  ;;  %v552_v16 = vpop.f32.mrb[25].mxu1  ;;  %v328_v22 = vadd.f32 %v327_v10, %v2305_v12 }
 0x119   :  { %1713 = vst [vmem:[#allocation4 + $0x28] sm:$0xff] %v1562_v8   ;;  %1726 = vst [vmem:[#allocation6 + $0x18] sm:$0xff] %v1632_v7   ;;  %v553_v17 = vadd.f32 %v552_v16, %v2336_v19  ;;  %v330_v26 = vadd.f32 %v329_v14, %v2308_v15 }
 0x11b   :  { %v1637_v18 = vpack.c.bf16 %v558_v13, %v553_v17  ;;  %v333_v20 = vpop.f32.mrb[26].mxu0  ;;  %v1812_v21 = vpop.f32.mrb[26].mxu1 }
 0x11c   :  { %v334_v23 = vadd.f32 %v333_v20, %v2305_v12  ;;  %v568_v6 = vadd.f32 %v1812_v21, %v2336_v19  ;;  %v335_v24 = vpop.f32.mrb[27].mxu0  ;;  %v562_v25 = vpop.f32.mrb[27].mxu1 }
 0x11d   :  { %1727 = vst [vmem:[#allocation6 + $0x20] sm:$0xff] %v1637_v18   ;;  %v336_v27 = vadd.f32 %v335_v24, %v2308_v15  ;;  %v563_v28 = vadd.f32 %v562_v25, %v2336_v19 }
 0x11e   :  { %v1487_v9 = vpack.c.bf16 %v334_v23, %v328_v22 }
 0x11f   :  { %v1567_v29 = vpack.c.bf16 %v336_v27, %v330_v26  ;;  %v1642_v30 = vpack.c.bf16 %v568_v6, %v563_v28  ;;  %v339_v31 = vpop.f32.mrb[28].mxu0  ;;  %v1815_v32 = vpop.f32.mrb[28].mxu1 }
 0x120   :  { %1699 = vst [vmem:[#allocation2 + $0x30] sm:$0xff] %v1487_v9   ;;  %v578_v33 = vadd.f32 %v1815_v32, %v2336_v19  ;;  %v341_v34 = vpop.f32.mrb[29].mxu0  ;;  %v572_v35 = vpop.f32.mrb[29].mxu1  ;;  %v340_v40 = vadd.f32 %v339_v31, %v2305_v12 }
 0x121   :  { %1714 = vst [vmem:[#allocation4 + $0x30] sm:$0xff] %v1567_v29   ;;  %1728 = vst [vmem:[#allocation6 + $0x28] sm:$0xff] %v1642_v30   ;;  %v573_v36 = vadd.f32 %v572_v35, %v2336_v19  ;;  %v342_v45 = vadd.f32 %v341_v34, %v2308_v15 }
 0x123   :  { %v1647_v37 = vpack.c.bf16 %v578_v33, %v573_v36  ;;  %v345_v38 = vpop.f32.mrb[30].mxu0  ;;  %v1818_v39 = vpop.f32.mrb[30].mxu1 }
 0x124   :  { %v346_v41 = vadd.f32 %v345_v38, %v2305_v12  ;;  %v588_v42 = vadd.f32 %v1818_v39, %v2336_v19  ;;  %v347_v43 = vpop.f32.mrb[31].mxu0  ;;  %v582_v44 = vpop.f32.mrb[31].mxu1 }
 0x125   :  { %1729 = vst [vmem:[#allocation6 + $0x30] sm:$0xff] %v1647_v37   ;;  %v348_v46 = vadd.f32 %v347_v43, %v2308_v15  ;;  %v583_v47 = vadd.f32 %v582_v44, %v2336_v19 }
 0x126   :  { %v1492_v48 = vpack.c.bf16 %v346_v41, %v340_v40 }
 0x127   :  { %v1572_v49 = vpack.c.bf16 %v348_v46, %v342_v45  ;;  %v1652_v50 = vpack.c.bf16 %v588_v42, %v583_v47  ;;  %v351_v51 = vpop.f32.mrb[32].mxu0  ;;  %v1821_v52 = vpop.f32.mrb[32].mxu1 }
 0x128   :  { %1700 = vst [vmem:[#allocation2 + $0x38] sm:$0xff] %v1492_v48   ;;  %v598_v53 = vadd.f32 %v1821_v52, %v2336_v19  ;;  %v353_v54 = vpop.f32.mrb[33].mxu0  ;;  %v592_v55 = vpop.f32.mrb[33].mxu1  ;;  %v352_v60 = vadd.f32 %v351_v51, %v2305_v12 }
 0x129   :  { %1715 = vst [vmem:[#allocation4 + $0x38] sm:$0xff] %v1572_v49   ;;  %1730 = vst [vmem:[#allocation6 + $0x38] sm:$0xff] %v1652_v50   ;;  %v593_v56 = vadd.f32 %v592_v55, %v2336_v19  ;;  %v354_v1 = vadd.f32 %v353_v54, %v2308_v15 }
 0x12b   :  { %v1657_v57 = vpack.c.bf16 %v598_v53, %v593_v56  ;;  %v357_v58 = vpop.f32.mrb[34].mxu0  ;;  %v1824_v59 = vpop.f32.mrb[34].mxu1 }
 0x12c   :  { %v358_v61 = vadd.f32 %v357_v58, %v2305_v12  ;;  %v608_v62 = vadd.f32 %v1824_v59, %v2336_v19  ;;  %v359_v63 = vpop.f32.mrb[35].mxu0  ;;  %v602_v0 = vpop.f32.mrb[35].mxu1 }
 0x12d   :  { %1731 = vst [vmem:[#allocation6 + $0x40] sm:$0xff] %v1657_v57   ;;  %v360_v2 = vadd.f32 %v359_v63, %v2308_v15  ;;  %v603_v3 = vadd.f32 %v602_v0, %v2336_v19 }
 0x12e   :  { %v1497_v4 = vpack.c.bf16 %v358_v61, %v352_v60 }
 0x12f   :  { %v1577_v5 = vpack.c.bf16 %v360_v2, %v354_v1  ;;  %v1662_v8 = vpack.c.bf16 %v608_v62, %v603_v3  ;;  %v363_v7 = vpop.f32.mrb[36].mxu0  ;;  %v1827_v10 = vpop.f32.mrb[36].mxu1 }
 0x130   :  { %1701 = vst [vmem:[#allocation2 + $0x40] sm:$0xff] %v1497_v4   ;;  %v618_v11 = vadd.f32 %v1827_v10, %v2336_v19  ;;  %v365_v13 = vpop.f32.mrb[37].mxu0  ;;  %v612_v14 = vpop.f32.mrb[37].mxu1  ;;  %v364_v21 = vadd.f32 %v363_v7, %v2305_v12 }
 0x131   :  { %1716 = vst [vmem:[#allocation4 + $0x40] sm:$0xff] %v1577_v5   ;;  %1732 = vst [vmem:[#allocation6 + $0x48] sm:$0xff] %v1662_v8   ;;  %v613_v16 = vadd.f32 %v612_v14, %v2336_v19  ;;  %v366_v25 = vadd.f32 %v365_v13, %v2308_v15 }
 0x133   :  { %v1667_v17 = vpack.c.bf16 %v618_v11, %v613_v16  ;;  %v369_v18 = vpop.f32.mrb[38].mxu0  ;;  %v1830_v20 = vpop.f32.mrb[38].mxu1 }
 0x134   :  { %v370_v22 = vadd.f32 %v369_v18, %v2305_v12  ;;  %v628_v23 = vadd.f32 %v1830_v20, %v2336_v19  ;;  %v371_v6 = vpop.f32.mrb[39].mxu0  ;;  %v622_v24 = vpop.f32.mrb[39].mxu1 }
 0x135   :  { %1733 = vst [vmem:[#allocation6 + $0x50] sm:$0xff] %v1667_v17   ;;  %v372_v26 = vadd.f32 %v371_v6, %v2308_v15  ;;  %v623_v27 = vadd.f32 %v622_v24, %v2336_v19 }
 0x136   :  { %v1502_v28 = vpack.c.bf16 %v370_v22, %v364_v21 }
 0x137   :  { %v1582_v9 = vpack.c.bf16 %v372_v26, %v366_v25  ;;  %v1672_v29 = vpack.c.bf16 %v628_v23, %v623_v27  ;;  %v375_v30 = vpop.f32.mrb[40].mxu0  ;;  %v1833_v31 = vpop.f32.mrb[40].mxu1 }
 0x138   :  { %1702 = vst [vmem:[#allocation2 + $0x48] sm:$0xff] %v1502_v28   ;;  %v638_v32 = vadd.f32 %v1833_v31, %v2336_v19  ;;  %v377_v33 = vpop.f32.mrb[41].mxu0  ;;  %v632_v34 = vpop.f32.mrb[41].mxu1  ;;  %v376_v39 = vadd.f32 %v375_v30, %v2305_v12 }
 0x139   :  { %1717 = vst [vmem:[#allocation4 + $0x48] sm:$0xff] %v1582_v9   ;;  %1734 = vst [vmem:[#allocation6 + $0x58] sm:$0xff] %v1672_v29   ;;  %v633_v35 = vadd.f32 %v632_v34, %v2336_v19  ;;  %v378_v44 = vadd.f32 %v377_v33, %v2308_v15 }
 0x13b   :  { %v1677_v36 = vpack.c.bf16 %v638_v32, %v633_v35  ;;  %v381_v37 = vpop.f32.mrb[42].mxu0  ;;  %v1836_v38 = vpop.f32.mrb[42].mxu1 }
 0x13c   :  { %v382_v40 = vadd.f32 %v381_v37, %v2305_v12  ;;  %v648_v41 = vadd.f32 %v1836_v38, %v2336_v19  ;;  %v383_v42 = vpop.f32.mrb[43].mxu0  ;;  %v642_v43 = vpop.f32.mrb[43].mxu1 }
 0x13d   :  { %1735 = vst [vmem:[#allocation6 + $0x60] sm:$0xff] %v1677_v36   ;;  %v384_v45 = vadd.f32 %v383_v42, %v2308_v15  ;;  %v643_v46 = vadd.f32 %v642_v43, %v2336_v19 }
 0x13e   :  { %v1507_v47 = vpack.c.bf16 %v382_v40, %v376_v39 }
 0x13f   :  { %v1587_v48 = vpack.c.bf16 %v384_v45, %v378_v44  ;;  %v1682_v49 = vpack.c.bf16 %v648_v41, %v643_v46  ;;  %v387_v50 = vpop.f32.mrb[44].mxu0  ;;  %v1839_v51 = vpop.f32.mrb[44].mxu1 }
 0x140   :  { %1703 = vst [vmem:[#allocation2 + $0x50] sm:$0xff] %v1507_v47   ;;  %v658_v52 = vadd.f32 %v1839_v51, %v2336_v19  ;;  %v389_v53 = vpop.f32.mrb[45].mxu0  ;;  %v652_v54 = vpop.f32.mrb[45].mxu1  ;;  %v388_v59 = vadd.f32 %v387_v50, %v2305_v12 }
 0x141   :  { %1718 = vst [vmem:[#allocation4 + $0x50] sm:$0xff] %v1587_v48   ;;  %1736 = vst [vmem:[#allocation6 + $0x68] sm:$0xff] %v1682_v49   ;;  %v653_v55 = vadd.f32 %v652_v54, %v2336_v19  ;;  %v390_v0 = vadd.f32 %v389_v53, %v2308_v15 }
 0x143   :  { %v1687_v56 = vpack.c.bf16 %v658_v52, %v653_v55  ;;  %v393_v57 = vpop.f32.mrb[46].mxu0  ;;  %v1842_v58 = vpop.f32.mrb[46].mxu1 }
 0x144   :  { %v394_v60 = vadd.f32 %v393_v57, %v2305_v12  ;;  %v668_v61 = vadd.f32 %v1842_v58, %v2336_v19  ;;  %v395_v62 = vpop.f32.mrb[47].mxu0  ;;  %v662_v63 = vpop.f32.mrb[47].mxu1 }
 0x145   :  { %1737 = vst [vmem:[#allocation6 + $0x70] sm:$0xff] %v1687_v56   ;;  %v396_v1 = vadd.f32 %v395_v62, %v2308_v15  ;;  %v663_v2 = vadd.f32 %v662_v63, %v2336_v19 }
 0x146   :  { %v1512_v3 = vpack.c.bf16 %v394_v60, %v388_v59 }
 0x147   :  { %v1592_v4 = vpack.c.bf16 %v396_v1, %v390_v0  ;;  %v1692_v5 = vpack.c.bf16 %v668_v61, %v663_v2 }
 0x148   :  { %1704 = vst [vmem:[#allocation2 + $0x58] sm:$0xff] %v1512_v3  }
 0x149   :  { %1719 = vst [vmem:[#allocation4 + $0x58] sm:$0xff] %v1592_v4   ;;  %1738 = vst [vmem:[#allocation6 + $0x78] sm:$0xff] %v1692_v5  }
 0x14a   :  { %1900 = shalt.err (!%p1897_p4)
}
 0x14b   :  { %s1901_s11 = scalar_lea.hbm %s2472_s3, 2048 }
 0x14c   :  { %p1902_p5 = scmp.ne.s32.totalorder %s2472_s3, %s1901_s11  ;;  %p1905_p6 = scmp.lt.u32.totalorder %s1901_s11, %s2472_s3 }
 0x14e   :  { %p1907_p7 = pnand %p1905_p6, %p1902_p5 }
 0x150   :  { %1910 = shalt.err (!%p1907_p7)
}
 0x151   :  { %s1963_s16 = smov 64   ;;  %s1964_s17 = smov 4  }
 0x152   :  { %1162 = dma.vmem_to_hbm [thread:$0]  %s1157_s28, 2048, %s2472_s3, [#allocation3], %s1963_s16, %s1963_s16, %s1964_s17  }
 0x153   :  { %s1911_s20 = scalar_lea.vmem %s2410_s30, 2048  ;;  %p1916_p9 = scmp.lt.s32.totalorder %s2410_s30, %s2410_s30 }
 0x154   :  { %p1912_p8 = scmp.ne.s32.totalorder %s2410_s30, %s1911_s20  ;;  %p1917_p10 = scmp.lt.s32.totalorder %s1911_s20, %s1911_s20 }
 0x156   :  { %p1918_p11 = por %p1917_p10, %p1916_p9 }
 0x158   :  { %p1919_p12 = pnand %p1918_p11, %p1912_p8 }
 0x15a   :  { %1922 = shalt.err (!%p1919_p12)
}
 0x15b   :  { %s1923_s23 = scalar_lea.hbm %s2473_s4, 2048 }
 0x15c   :  { %p1924_p13 = scmp.ne.s32.totalorder %s2473_s4, %s1923_s23  ;;  %p1927_p0 = scmp.lt.u32.totalorder %s1923_s23, %s2473_s4 }
 0x15e   :  { %p1929_p1 = pnand %p1927_p0, %p1924_p13 }
 0x160   :  { %1932 = shalt.err (!%p1929_p1)
}
 0x161   :  { %1174 = dma.vmem_to_hbm [thread:$0]  %s2410_s30, 2048, %s2473_s4, [#allocation5], %s1963_s16, %s1963_s16, %s1964_s17  }
 0x162   :  { %s1933_s1 = scalar_lea.vmem %s2412_s7, 2048  ;;  %p1938_p3 = scmp.lt.s32.totalorder %s2412_s7, %s2412_s7 }
 0x163   :  { %p1934_p2 = scmp.ne.s32.totalorder %s2412_s7, %s1933_s1  ;;  %p1939_p4 = scmp.lt.s32.totalorder %s1933_s1, %s1933_s1 }
 0x165   :  { %p1940_p5 = por %p1939_p4, %p1938_p3 }
 0x167   :  { %p1941_p6 = pnand %p1940_p5, %p1934_p2 }
 0x169   :  { %1944 = shalt.err (!%p1941_p6)
}
 0x16a   :  { %s1945_s29 = scalar_lea.hbm %s2474_s5, 2048 }
 0x16b   :  { %p1946_p7 = scmp.ne.s32.totalorder %s2474_s5, %s1945_s29  ;;  %p1949_p8 = scmp.lt.u32.totalorder %s1945_s29, %s2474_s5 }
 0x16d   :  { %p1951_p9 = pnand %p1949_p8, %p1946_p7 }
 0x16f   :  { %1954 = shalt.err (!%p1951_p9)
}
 0x170   :  { %1186 = dma.vmem_to_hbm [thread:$0]  %s2412_s7, 2048, %s2474_s5, [#allocation5], %s1963_s16, %s1963_s16, %s1964_s17  }
 0x171   :  { %1955 = dma.done.wait [#allocation3], 2048  }
 0x172   :  { %1956 = vsyncadd [#allocation3], 4294965248 }
 0x173   :  { %1957 = dma.done.wait [#allocation5], 4096  }
 0x174   :  { %1958 = vsyncadd [#allocation5], 4294963200 }
 0x175   :  { %1196 = vsyncpa [#allocation3], 1 }
 0x176   :  { %1197 = vsyncpa [#allocation5], 1 }

</bundles_post_ra>
